<compile_context>
chip_gen: v7x
topology: tpu7x:2x2x1
jax: 0.10.0
libtpu: 0.0.40
codegen_flags: <defaults>
</compile_context>

<pallas_src>
import functools

import jax
import jax.numpy as jnp
from jax.experimental import pallas as pl
from jax.experimental.pallas import tpu as pltpu


def _round_up(n, m):
    return ((n + m - 1) // m) * m


def _sigmoid(x):
    # Exact sigmoid: exp runs on the EUP, the divide is exact (no approx
    # reciprocal -> bit-level agreement with jax.nn.sigmoid within f32 rounding).
    return 1.0 / (1.0 + jnp.exp(-x))


def mlp_kernel(x_ref, w1_ref, b1_ref, w2_ref, b2_ref, w3_ref, b3_ref, o_ref):
    # x_ref: (8, TB)  batch on lanes.
    x = x_ref[...].astype(jnp.float32)

    # Layer 1: (6,8) @ (8,TB) + (6,1) -> (6,TB)
    h1 = jnp.dot(w1_ref[...], x, preferred_element_type=jnp.float32) + b1_ref[...]
    h1 = _sigmoid(h1)

    # Layer 2: (4,6) @ (6,TB) + (4,1) -> (4,TB)
    h2 = jnp.dot(w2_ref[...], h1, preferred_element_type=jnp.float32) + b2_ref[...]
    h2 = _sigmoid(h2)

    # Layer 3: (1,4) @ (4,TB) + (1,1) -> (1,TB)  (lane-dense output store)
    h3 = jnp.dot(w3_ref[...], h2, preferred_element_type=jnp.float32) + b3_ref[...]
    o_ref[...] = _sigmoid(h3).astype(o_ref.dtype)


@functools.partial(jax.jit, static_argnames=("tb",))
def mlp_forward(x, params, *, tb=2048):
    """x: (B, 8) float32 -> (B, 1) float32 (matches PyTorch Model.forward)."""
    w1, b1, w2, b2, w3, b3 = params  # w*: (out,in), b*: (out,1)
    B = x.shape[0]

    # Batch to lanes; pad the batch to a multiple of the lane-tile.
    tb = min(tb, _round_up(B, 128))
    bp = _round_up(B, tb)
    xt = x.T  # (8, B)
    if bp != B:
        xt = jnp.pad(xt, ((0, 0), (0, bp - B)))

    const = lambda a: pl.BlockSpec(a.shape, lambda i: (0, 0))  # VMEM-resident weights

    out_t = pl.pallas_call(
        mlp_kernel,
        out_shape=jax.ShapeDtypeStruct((1, bp), jnp.float32),
        grid=(bp // tb,),
        in_specs=[
            pl.BlockSpec((8, tb), lambda i: (0, i)),  # x tile: batch on lanes
            const(w1), const(b1),
            const(w2), const(b2),
            const(w3), const(b3),
        ],
        out_specs=pl.BlockSpec((1, tb), lambda i: (0, i)),
        compiler_params=pltpu.CompilerParams(
            dimension_semantics=("parallel",),  # megacore-friendly on v7x; harmless elsewhere
        ),
    )(xt, w1, b1, w2, b2, w3, b3)

    return out_t[:, :B].T  # (B, 1)


def init_params(key):
    """Deterministic init mimicking torch.nn.Linear's U(-1/sqrt(fan_in), 1/sqrt(fan_in)).

    Weights stored PyTorch-style (out_features, in_features); biases as (out_features, 1)
    so the kernel broadcasts them over the lane (batch) dimension.
    """
    dims = [(8, 6), (6, 4), (4, 1)]
    params = []
    for i, (fin, fout) in enumerate(dims):
        kw, kb = jax.random.split(jax.random.fold_in(key, i))
        bound = 1.0 / jnp.sqrt(float(fin))
        w = jax.random.uniform(kw, (fout, fin), jnp.float32, -bound, bound)
        b = jax.random.uniform(kb, (fout, 1), jnp.float32, -bound, bound)
        params += [w, b]
    return tuple(params)


def mlp_reference(x, params):
    w1, b1, w2, b2, w3, b3 = params
    h1 = jax.nn.sigmoid(x @ w1.T + b1.T)
    h2 = jax.nn.sigmoid(h1 @ w2.T + b2.T)
    return jax.nn.sigmoid(h2 @ w3.T + b3.T)


if __name__ == "__main__":
    key = jax.random.PRNGKey(0)
    kx, kp = jax.random.split(key)

    B = 200  # not a multiple of the lane tile -> exercises padding + multi-step grid
    x = jax.random.normal(kx, (B, 8), jnp.float32)
    params = init_params(kp)

    out = mlp_forward(x, params, tb=128)  # grid of 2 lane-dense blocks
    out = jax.block_until_ready(out)

    ref = mlp_reference(x, params)
    assert out.shape == (B, 1)
    assert jnp.allclose(out, ref, atol=1e-5, rtol=1e-5), float(jnp.max(jnp.abs(out - ref)))

    print("KERNEL_OK")
</pallas_src>

<mosaic_0001>
module attributes {stable_mosaic.version = 11 : i64} {
  func.func @mlp_kernel(%arg0: i32, %arg1: memref<8x128xf32, #tpu.memory_space<vmem>>, %arg2: memref<6x8xf32, #tpu.memory_space<vmem>>, %arg3: memref<6x1xf32, #tpu.memory_space<vmem>>, %arg4: memref<4x6xf32, #tpu.memory_space<vmem>>, %arg5: memref<4x1xf32, #tpu.memory_space<vmem>>, %arg6: memref<1x4xf32, #tpu.memory_space<vmem>>, %arg7: memref<1x1xf32, #tpu.memory_space<vmem>>, %arg8: memref<1x128xf32, #tpu.memory_space<vmem>>) attributes {dimension_semantics = [#tpu.dimension_semantics<parallel>], iteration_bounds = array<i64: 2>, scalar_prefetch = 0 : i64, scratch_operands = 0 : i64, tpu.core_type = #tpu.core_type<tc>, window_params = [{transform_indices = @transform_0, window_bounds = array<i64: 8, 128>}, {pipeline_mode = #tpu.pipeline_mode<synchronous>, transform_indices = @transform_1, window_bounds = array<i64: 6, 8>}, {pipeline_mode = #tpu.pipeline_mode<synchronous>, transform_indices = @transform_2, window_bounds = array<i64: 6, 1>}, {pipeline_mode = #tpu.pipeline_mode<synchronous>, transform_indices = @transform_3, window_bounds = array<i64: 4, 6>}, {pipeline_mode = #tpu.pipeline_mode<synchronous>, transform_indices = @transform_4, window_bounds = array<i64: 4, 1>}, {pipeline_mode = #tpu.pipeline_mode<synchronous>, transform_indices = @transform_5, window_bounds = array<i64: 1, 4>}, {pipeline_mode = #tpu.pipeline_mode<synchronous>, transform_indices = @transform_6, window_bounds = array<i64: 1, 1>}, {transform_indices = @transform_7, window_bounds = array<i64: 1, 128>}]} {
    %c0 = arith.constant 0 : index
    %c0_0 = arith.constant 0 : index
    %0 = vector.load %arg1[%c0, %c0_0] : memref<8x128xf32, #tpu.memory_space<vmem>>, vector<8x128xf32>
    %c0_1 = arith.constant 0 : index
    %c0_2 = arith.constant 0 : index
    %1 = vector.load %arg2[%c0_1, %c0_2] : memref<6x8xf32, #tpu.memory_space<vmem>>, vector<6x8xf32>
    %cst = arith.constant dense<0.000000e+00> : vector<6x128xf32>
    %2 = tpu.matmul %1, %0, %cst {dimension_numbers = #tpu.dot_dimension_numbers<[1], [0], [0], [1], [0, 0, 1, 1], [], []>} : vector<6x8xf32>, vector<8x128xf32>, vector<6x128xf32> -> vector<6x128xf32>
    %c0_3 = arith.constant 0 : index
    %c0_4 = arith.constant 0 : index
    %3 = vector.load %arg3[%c0_3, %c0_4] : memref<6x1xf32, #tpu.memory_space<vmem>>, vector<6x1xf32>
    %4 = vector.broadcast %3 : vector<6x1xf32> to vector<6x128xf32>
    %5 = arith.addf %2, %4 : vector<6x128xf32>
    %cst_5 = arith.constant 0.000000e+00 : f32
    %6 = vector.broadcast %cst_5 : f32 to vector<6x128xf32>
    %7 = arith.subf %6, %5 : vector<6x128xf32>
    %8 = math.exp %7 : vector<6x128xf32>
    %cst_6 = arith.constant 1.000000e+00 : f32
    %9 = vector.broadcast %cst_6 : f32 to vector<6x128xf32>
    %10 = arith.addf %9, %8 : vector<6x128xf32>
    %cst_7 = arith.constant 1.000000e+00 : f32
    %11 = vector.broadcast %cst_7 : f32 to vector<6x128xf32>
    %12 = arith.divf %11, %10 : vector<6x128xf32>
    %c0_8 = arith.constant 0 : index
    %c0_9 = arith.constant 0 : index
    %13 = vector.load %arg4[%c0_8, %c0_9] : memref<4x6xf32, #tpu.memory_space<vmem>>, vector<4x6xf32>
    %cst_10 = arith.constant dense<0.000000e+00> : vector<4x128xf32>
    %14 = tpu.matmul %13, %12, %cst_10 {dimension_numbers = #tpu.dot_dimension_numbers<[1], [0], [0], [1], [0, 0, 1, 1], [], []>} : vector<4x6xf32>, vector<6x128xf32>, vector<4x128xf32> -> vector<4x128xf32>
    %c0_11 = arith.constant 0 : index
    %c0_12 = arith.constant 0 : index
    %15 = vector.load %arg5[%c0_11, %c0_12] : memref<4x1xf32, #tpu.memory_space<vmem>>, vector<4x1xf32>
    %16 = vector.broadcast %15 : vector<4x1xf32> to vector<4x128xf32>
    %17 = arith.addf %14, %16 : vector<4x128xf32>
    %cst_13 = arith.constant 0.000000e+00 : f32
    %18 = vector.broadcast %cst_13 : f32 to vector<4x128xf32>
    %19 = arith.subf %18, %17 : vector<4x128xf32>
    %20 = math.exp %19 : vector<4x128xf32>
    %cst_14 = arith.constant 1.000000e+00 : f32
    %21 = vector.broadcast %cst_14 : f32 to vector<4x128xf32>
    %22 = arith.addf %21, %20 : vector<4x128xf32>
    %cst_15 = arith.constant 1.000000e+00 : f32
    %23 = vector.broadcast %cst_15 : f32 to vector<4x128xf32>
    %24 = arith.divf %23, %22 : vector<4x128xf32>
    %c0_16 = arith.constant 0 : index
    %c0_17 = arith.constant 0 : index
    %25 = vector.load %arg6[%c0_16, %c0_17] : memref<1x4xf32, #tpu.memory_space<vmem>>, vector<1x4xf32>
    %cst_18 = arith.constant dense<0.000000e+00> : vector<1x128xf32>
    %26 = tpu.matmul %25, %24, %cst_18 {dimension_numbers = #tpu.dot_dimension_numbers<[1], [0], [0], [1], [0, 0, 1, 1], [], []>} : vector<1x4xf32>, vector<4x128xf32>, vector<1x128xf32> -> vector<1x128xf32>
    %c0_19 = arith.constant 0 : index
    %c0_20 = arith.constant 0 : index
    %27 = vector.load %arg7[%c0_19, %c0_20] : memref<1x1xf32, #tpu.memory_space<vmem>>, vector<1x1xf32>
    %28 = vector.broadcast %27 : vector<1x1xf32> to vector<1x128xf32>
    %29 = arith.addf %26, %28 : vector<1x128xf32>
    %cst_21 = arith.constant 0.000000e+00 : f32
    %30 = vector.broadcast %cst_21 : f32 to vector<1x128xf32>
    %31 = arith.subf %30, %29 : vector<1x128xf32>
    %32 = math.exp %31 : vector<1x128xf32>
    %cst_22 = arith.constant 1.000000e+00 : f32
    %33 = vector.broadcast %cst_22 : f32 to vector<1x128xf32>
    %34 = arith.addf %33, %32 : vector<1x128xf32>
    %cst_23 = arith.constant 1.000000e+00 : f32
    %35 = vector.broadcast %cst_23 : f32 to vector<1x128xf32>
    %36 = arith.divf %35, %34 : vector<1x128xf32>
    %c0_24 = arith.constant 0 : index
    %c0_25 = arith.constant 0 : index
    %37 = vector.load %arg8[%c0_24, %c0_25] : memref<1x128xf32, #tpu.memory_space<vmem>>, vector<1x128xf32>
    tpu.vector_store %arg8[%c0_24, %c0_25], %36 {strides = array<i32>} : memref<1x128xf32, #tpu.memory_space<vmem>>, vector<1x128xf32>,
    return
  }
  func.func @transform_0(%arg0: i32) -> (i32, i32) {
    %c0_i32 = arith.constant 0 : i32
    %c0_i32_0 = arith.constant 0 : i32
    return %c0_i32, %arg0 : i32, i32
  }
  func.func @transform_1(%arg0: i32) -> (i32, i32) {
    %c0_i32 = arith.constant 0 : i32
    %c0_i32_0 = arith.constant 0 : i32
    %c0_i32_1 = arith.constant 0 : i32
    return %c0_i32, %c0_i32_0 : i32, i32
  }
  func.func @transform_2(%arg0: i32) -> (i32, i32) {
    %c0_i32 = arith.constant 0 : i32
    %c0_i32_0 = arith.constant 0 : i32
    %c0_i32_1 = arith.constant 0 : i32
    return %c0_i32, %c0_i32_0 : i32, i32
  }
  func.func @transform_3(%arg0: i32) -> (i32, i32) {
    %c0_i32 = arith.constant 0 : i32
    %c0_i32_0 = arith.constant 0 : i32
    %c0_i32_1 = arith.constant 0 : i32
    return %c0_i32, %c0_i32_0 : i32, i32
  }
  func.func @transform_4(%arg0: i32) -> (i32, i32) {
    %c0_i32 = arith.constant 0 : i32
    %c0_i32_0 = arith.constant 0 : i32
    %c0_i32_1 = arith.constant 0 : i32
    return %c0_i32, %c0_i32_0 : i32, i32
  }
  func.func @transform_5(%arg0: i32) -> (i32, i32) {
    %c0_i32 = arith.constant 0 : i32
    %c0_i32_0 = arith.constant 0 : i32
    %c0_i32_1 = arith.constant 0 : i32
    return %c0_i32, %c0_i32_0 : i32, i32
  }
  func.func @transform_6(%arg0: i32) -> (i32, i32) {
    %c0_i32 = arith.constant 0 : i32
    %c0_i32_0 = arith.constant 0 : i32
    %c0_i32_1 = arith.constant 0 : i32
    return %c0_i32, %c0_i32_0 : i32, i32
  }
  func.func @transform_7(%arg0: i32) -> (i32, i32) {
    %c0_i32 = arith.constant 0 : i32
    %c0_i32_0 = arith.constant 0 : i32
    return %c0_i32, %arg0 : i32, i32
  }
}

</mosaic_0001>

<bundles_post_ra>
// kernel: mlp_forward.1
= control target key start
LH: loop header
LB: loop body
LE: loop exit
PB: predicated region body
PF: predicated region fallthrough
CT: control target
= control target key end

     0   :  { %s709_s26 = smov 0   ;;  %s748_s0 = inlined_call_operand.vmem [shape: f32[8,256], index: 0, kind: input, shape index: {}]   ;;  %s749_s1 = inlined_call_operand.vmem [shape: f32[6,8], index: 1, kind: input, shape index: {}]   ;;  %s750_s2 = inlined_call_operand.vmem [shape: f32[6,1], index: 2, kind: input, shape index: {}]   ;;  %s751_s3 = inlined_call_operand.vmem [shape: f32[4,6], index: 3, kind: input, shape index: {}]   ;;  %s752_s4 = inlined_call_operand.vmem [shape: f32[4,1], index: 4, kind: input, shape index: {}]   ;;  %s753_s5 = inlined_call_operand.vmem [shape: f32[1,4], index: 5, kind: input, shape index: {}]   ;;  %s754_s6 = inlined_call_operand.<no memory space> [shape: f32[1,1], index: 6, kind: input, shape index: {}]   ;;  %s755_s7 = inlined_call_operand.vmem [shape: f32[1,256], index: 7, kind: output, shape index: {}]  }
   0x1   :  { %v12_v0 = vstv %s754_s6 }
   0x2   :  { %13 = vst [vmem:[#allocation2] sm:$0x1] %v12_v0 }
   0x3 LB: > { %s596_s27 = sadd.s32 4294967295, %s661_s26   ;;  %p600_p0 = scmp.ge.s32.totalorder %s661_s26, 1  ;;  %s661_s26 = sphi %s709_s26, %s19_s26  }
   0x4   : > { %p238_p1 = scmp.lt.s32.totalorder %s661_s26, 3 }
   0x6   : > { %p239_p2 = pnand %p600_p0, %p238_p1 }
   0x7   : > { %p267_p3 = scmp.lt.s32.totalorder (!%p239_p2), %s596_s27, 1  ;;  %v663_v1 = vmov (!%p239_p2), 0.0   ;;  %vm664_vm0 = vmmov (!%p239_p2), 0   ;;  %v276_v2 = vld [vmem:[%s750_s2] sm:$0x3f] (!%p239_p2)  ;;  %v665_v3 = vmov (!%p239_p2), 0   ;;  %v460_v28 = vlaneseq (!%p239_p2) }
   0x8   : > { %242 = sbr.rel (%p239_p2) target bundleno = 749 (0x2ed), region = 48  ;;  %615 = vmatprep.subr.mxu0 (!%p239_p2), %v663_v1  ;;  %617 = vmatprep.mubr.msk.f32.mxu0 (!%p239_p2), %vm664_vm0, %v663_v1  ;;  %v363_v4 = vld [vmem:[%s752_s4] sm:$0xf] (!%p239_p2)  ;;  %vm282_vm1 = vcmask (!%p239_p2), 64512   ;;  %vm373_vm2 = vcmask (!%p239_p2), 1045504   ;;  %vm369_vm3 = vcmask (!%p239_p2), 48128  }
   0x9   : > { %641 = vset.pattern.permute.xlu0 (!%p239_p2), %v665_v3  ;;  %620 = vmatprep.subr.mxu1 (!%p239_p2), %v663_v1  ;;  %v275_v5 = vld [vmem:[%s749_s1] sm:$0x3f] (!%p239_p2)  ;;  %vm468_vm4 = vcmask (!%p239_p2), 1043456   ;;  %vm464_vm5 = vcmask (!%p239_p2), 31744   ;;  %v461_v29 = vshrl.u32 (!%p239_p2), %v460_v28, 7 }
   0xa   : > { %279 = vperm.xlu0 (!%p239_p2), %641, %v276_v2   ;;  %622 = vmatprep.mubr.msk.f32.mxu1 (!%p239_p2), %vm664_vm0, %v663_v1  ;;  %v362_v15 = vld [vmem:[%s751_s3] sm:$0xf] (!%p239_p2) }
   0xb   : > { %642 = vset.pattern.permute.xlu1 (!%p239_p2), %v665_v3  ;;  %v454_v17 = vld [vmem:[#allocation2] sm:$0x1] (!%p239_p2)  ;;  %v462_v30 = vsub.s32 (!%p239_p2), 0, %v461_v29 }
   0xc   : > { %457 = vperm.xlu1 (!%p239_p2), %642, %v454_v17   ;;  %v453_v26 = vld [vmem:[%s753_s5] sm:$0x1] (!%p239_p2) }
   0xe   : > { %366 = vperm.xlu0 (!%p239_p2), %641, %v363_v4  }
   0xf   : > { %s757_s27 = smov (!%p267_p3, %s596_s27), 1 }
  0x10   : > { %s601_s29 = sshll.u32 %s757_s27, 3  ;;  %s273_s20 = scalar_lea.vmem %s755_s7, %s757_s27 }
  0x11   : > { %s270_s11 = scalar_lea.vmem %s748_s0, %s601_s29 }
  0x12   : > { %v274_v6 = vld [vmem:[%s270_s11] sm:$0xff] }
  0x13   : > { %616 = vmatpush3.msra.mxu0 %v274_v6 }
  0x14   : > { %618 = vmatmul.mubr.msk.f32.vlgmr.msra.gmra.mrb[0].mxu0 %vm282_vm1, %v275_v5  ;;  %625 = vmatprep.subr.mxu0 %v663_v1 }
  0x15   : > { %627 = vmatprep.mubr.msk.f32.mxu0 %vm664_vm0, %v663_v1 }
  0x89   : > { %v280_v7 = vpop.permute.xlu0 %279 }
  0x8b   : > { %v458_v31 = vpop.permute.xlu1 %457 }
  0x8c   : > { %v463_v32 = vrot.slane %v458_v31, %v462_v30 }
  0x8d   : > { %v367_v18 = vpop.permute.xlu0 %366 }
  0xe7   : > { %v352_v8 = vpop.f32.mrb[0].mxu0 }
  0xe8   : > { %v353_v9 = vadd.f32 %v352_v8, %v280_v7  ;;  %v619_v10 = vpop.f32.mrb[1].mxu0 }
  0xea   : > { %v356_v11 = vsub.f32 0.0, %v353_v9 }
  0xec   : > { %v357_v12 = vmul.f32 1.442695, %v356_v11 }
  0xee   : > { %643 = vpow2.f32 %v357_v12 }
  0xf8   : > { %v644_v13 = vpop.eup %643 }
  0xf9   : > { %v359_v14 = vadd.f32 1.0, %v644_v13 }
  0xfb   : > { %645 = vrcp.f32 %v359_v14 }
 0x105   : > { %v646_v16 = vpop.eup %645 }
 0x106   : > { %621 = vmatpush3.msk.msra.mxu1 %vm373_vm2, %v646_v16 }
 0x107   : > { %623 = vmatmul.mubr.msk.f32.vlgmr.msra.gmra.mrb[0].mxu1 %vm369_vm3, %v362_v15 }
 0x1da   : > { %v443_v19 = vpop.f32.mrb[0].mxu1 }
 0x1db   : > { %v444_v20 = vadd.f32 %v443_v19, %v367_v18  ;;  %v624_v21 = vpop.f32.mrb[1].mxu1 }
 0x1dd   : > { %v447_v22 = vsub.f32 0.0, %v444_v20 }
 0x1df   : > { %v448_v23 = vmul.f32 1.442695, %v447_v22 }
 0x1e1   : > { %647 = vpow2.f32 %v448_v23 }
 0x1eb   : > { %v648_v24 = vpop.eup %647 }
 0x1ec   : > { %v450_v25 = vadd.f32 1.0, %v648_v24 }
 0x1ee   : > { %649 = vrcp.f32 %v450_v25 }
 0x1f8   : > { %v650_v27 = vpop.eup %649 }
 0x1f9   : > { %626 = vmatpush3.msk.msra.mxu0 %vm468_vm4, %v650_v27 }
 0x1fa   : > { %628 = vmatmul.mubr.msk.f32.vlgmr.msra.gmra.mrb[2].mxu0 %vm464_vm5, %v453_v26 }
 0x2cd   : > { %v538_v33 = vpop.f32.mrb[2].mxu0 }
 0x2ce   : > { %v539_v34 = vadd.f32 %v538_v33, %v463_v32  ;;  %v629_v35 = vpop.f32.mrb[3].mxu0 }
 0x2d0   : > { %v542_v36 = vsub.f32 0.0, %v539_v34 }
 0x2d2   : > { %v543_v37 = vmul.f32 1.442695, %v542_v36 }
 0x2d4   : > { %651 = vpow2.f32 %v543_v37 }
 0x2de   : > { %v652_v38 = vpop.eup %651 }
 0x2df   : > { %v545_v39 = vadd.f32 1.0, %v652_v38 }
 0x2e1   : > { %653 = vrcp.f32 %v545_v39 }
 0x2eb   : > { %v654_v40 = vpop.eup %653 }
 0x2ec   : > { %548 = vst [vmem:[%s273_s20] sm:$0x1] %v654_v40 }
 0x2ed PF: > { %s19_s26 = sadd.s32 1, %s661_s26  }
 0x2ee   : > { %p16_p4 = scmp.ge.s32.totalorder %s19_s26, 4  }
 0x2f0   :  { %18 = sbr.rel (!%p16_p4) target bundleno = 3 (0x3), region = 78 }

</bundles_post_ra>
